<compile_context>
chip_gen: v7x
topology: tpu7x:2x2x1
jax: 0.10.0
libtpu: 0.0.40
codegen_flags: <defaults>
</compile_context>

<pallas_src>
import functools

import jax
import jax.numpy as jnp
from jax.experimental import pallas as pl
from jax.experimental.pallas import tpu as pltpu

HIDDEN_DIM = (200, 500, 100)
_LANE = 128
_SUBLANE = 8


def _round_up(n, m):
    return -(-n // m) * m


def mlp_kernel(x_ref, w1_ref, b1_ref, w2_ref, b2_ref, w3_ref, b3_ref, w4_ref,
               o_ref):
    # Entire hot path (3 matmul+bias+ReLU, 1 final matmul) fused in VMEM.
    # x arrives as f32; the bf16 cast happens here on the VPU instead of as a
    # separate HBM round-trip in the wrapper.
    h = jnp.dot(x_ref[...].astype(jnp.bfloat16), w1_ref[...],
                preferred_element_type=jnp.float32)
    h = jnp.maximum(h + b1_ref[...], 0.0)

    h = jnp.dot(h.astype(jnp.bfloat16), w2_ref[...],
                preferred_element_type=jnp.float32)
    h = jnp.maximum(h + b2_ref[...], 0.0)

    h = jnp.dot(h.astype(jnp.bfloat16), w3_ref[...],
                preferred_element_type=jnp.float32)
    h = jnp.maximum(h + b3_ref[...], 0.0)

    # Final layer: w4 is only row-padded, so the result (and the HBM
    # writeback) is out_dim columns wide, not a 128-lane padded slab.
    o_ref[...] = jnp.dot(h.astype(jnp.bfloat16), w4_ref[...],
                         preferred_element_type=jnp.float32).astype(o_ref.dtype)


def _choose_batch_tile(batch):
    """Batch-tile policy (see module docstring):
    single step for tiny batches; otherwise >=2 tiles (v7x megacore) with a
    1024-row cap so per-step MXU work dominates per-step grid overhead."""
    if batch <= 16:
        return _round_up(batch, _SUBLANE)
    half = _round_up(pl.cdiv(batch, 2), _SUBLANE)
    return min(1024, half)


@functools.partial(jax.jit, static_argnames=("batch_tile",))
def mlp_forward(x, padded_params, *, batch_tile=None):
    """x: [B, input_dim] float32 -> [B, output_dim] float32."""
    w1, b1, w2, b2, w3, b3, w4 = padded_params
    B, in_dim = x.shape
    out_dim = w4.shape[1]

    if batch_tile is None:
        batch_tile = _choose_batch_tile(B)
    batch_tile = _round_up(max(int(batch_tile), _SUBLANE), _SUBLANE)
    Bp = _round_up(B, batch_tile)
    if Bp != B:
        # Ragged last tile: pad with zero rows (sliced off below).  At most
        # batch_tile-1 wasted rows; negligible vs. B for the tile policy used.
        x = jnp.pad(x, ((0, Bp - B), (0, 0)))

    def const_spec(arr):
        shape = arr.shape
        # Constant index_map -> DMA'd once, resident across all grid steps.
        return pl.BlockSpec(shape, lambda i: (0,) * len(shape))

    grid_spec = pltpu.PrefetchScalarGridSpec(
        num_scalar_prefetch=0,
        grid=(Bp // batch_tile,),
        in_specs=[
            pl.BlockSpec((batch_tile, in_dim), lambda i: (i, 0)),
            const_spec(w1), const_spec(b1),
            const_spec(w2), const_spec(b2),
            const_spec(w3), const_spec(b3),
            const_spec(w4),
        ],
        out_specs=pl.BlockSpec((batch_tile, out_dim), lambda i: (i, 0)),
    )

    d1, d2, d3 = w2.shape[0], w3.shape[0], w4.shape[0]
    flops = 2 * Bp * (in_dim * d1 + d1 * d2 + d2 * d3 + d3 * out_dim)
    bytes_accessed = (
        x.size * x.dtype.itemsize
        + sum(p.size * p.dtype.itemsize for p in padded_params)
        + Bp * out_dim * 4)

    out = pl.pallas_call(
        mlp_kernel,
        out_shape=jax.ShapeDtypeStruct((Bp, out_dim), jnp.float32),
        grid_spec=grid_spec,
        compiler_params=pltpu.CompilerParams(
            dimension_semantics=("parallel",)),
        cost_estimate=pl.CostEstimate(
            flops=flops, transcendentals=0, bytes_accessed=bytes_accessed),
    )(x, w1, b1, w2, b2, w3, b3, w4)

    return out[:B]


def init_params(key, input_dim, output_dim, hidden_dim=HIDDEN_DIM):
    """Deterministic init mirroring nn.Linear's uniform(-1/sqrt(fan_in), ...).

    Weights stored as [in_features, out_features]; biases as [1, out]."""
    dims = [input_dim, *hidden_dim]
    params = []
    for i in range(len(hidden_dim)):
        fan_in, fan_out = dims[i], dims[i + 1]
        key, kw, kb = jax.random.split(key, 3)
        bound = 1.0 / jnp.sqrt(fan_in)
        w = jax.random.uniform(kw, (fan_in, fan_out), jnp.float32,
                               minval=-bound, maxval=bound)
        b = jax.random.uniform(kb, (1, fan_out), jnp.float32,
                               minval=-bound, maxval=bound)
        params.extend([w, b])
    # Final layer: Linear(hidden_dim[-1], output_dim, bias=False)
    key, kw = jax.random.split(key)
    bound = 1.0 / jnp.sqrt(hidden_dim[-1])
    w_last = jax.random.uniform(kw, (hidden_dim[-1], output_dim), jnp.float32,
                                minval=-bound, maxval=bound)
    params.append(w_last)
    return tuple(params)


def prepare_params(params):
    """Zero-pad hidden feature dims to multiples of 128, cast weights to bf16.

    * Layer-1 input dim (K) is NOT padded — <4% of FLOPs, padding would only
      inflate the x DMA.
    * Final weight is only row-padded; its out_dim columns stay as-is so the
      kernel output (and HBM writeback) is exactly (B, out_dim).
    * Biases stay f32 (bias-add/ReLU run on the f32 VPU path).  Zero-padded
      hidden units remain exactly zero through ReLU, so forward semantics are
      unchanged."""
    w1, b1, w2, b2, w3, b3, w4 = params
    in_dim = w1.shape[0]
    d1 = _round_up(w1.shape[1], _LANE)
    d2 = _round_up(w2.shape[1], _LANE)
    d3 = _round_up(w3.shape[1], _LANE)

    def pad_w(w, rows, cols):
        return jnp.pad(w, ((0, rows - w.shape[0]),
                           (0, cols - w.shape[1]))).astype(jnp.bfloat16)

    def pad_b(b, cols):
        return jnp.pad(b, ((0, 0), (0, cols - b.shape[1]))).astype(jnp.float32)

    return (pad_w(w1, in_dim, d1), pad_b(b1, d1),
            pad_w(w2, d1, d2), pad_b(b2, d2),
            pad_w(w3, d2, d3), pad_b(b3, d3),
            pad_w(w4, d3, w4.shape[1]))


def mlp_ref_f32(x, params):
    w1, b1, w2, b2, w3, b3, w4 = params
    h = jnp.maximum(x @ w1 + b1, 0.0)
    h = jnp.maximum(h @ w2 + b2, 0.0)
    h = jnp.maximum(h @ w3 + b3, 0.0)
    return h @ w4


def mlp_ref_bf16(x, params):
    """Reference with the kernel's bf16-input / f32-accumulate numerics."""
    w1, b1, w2, b2, w3, b3, w4 = params
    bf = jnp.bfloat16

    def dot(a, b):
        return jnp.dot(a.astype(bf), b.astype(bf),
                       preferred_element_type=jnp.float32)

    h = jnp.maximum(dot(x, w1) + b1, 0.0)
    h = jnp.maximum(dot(h, w2) + b2, 0.0)
    h = jnp.maximum(dot(h, w3) + b3, 0.0)
    return dot(h, w4)


if __name__ == "__main__":
    key = jax.random.PRNGKey(0)
    batch, input_dim, output_dim = 16, 32, 8

    k_x, k_p = jax.random.split(key)
    x = jax.random.normal(k_x, (batch, input_dim), jnp.float32)
    params = init_params(k_p, input_dim, output_dim)
    padded_params = prepare_params(params)

    out = mlp_forward(x, padded_params)
    out = jax.block_until_ready(out)
    assert out.shape == (batch, output_dim)

    # Tight check vs a reference with the same bf16-in / f32-accumulate math.
    ref_bf16 = mlp_ref_bf16(x, params)
    assert jnp.allclose(out, ref_bf16, atol=2e-3, rtol=2e-3), \
        "mismatch vs bf16-matched reference"

    # Loose check vs the full-f32 PyTorch-equivalent forward (bf16 tolerance).
    # TODO(synk): keep w4/w3 in f32 if bit-closer parity with PyTorch is needed.
    ref_f32 = mlp_ref_f32(x, params)
    assert jnp.allclose(out, ref_f32, atol=1e-2, rtol=2e-2), \
        "mismatch vs f32 reference"

    print("KERNEL_OK")
</pallas_src>

<mosaic_0001>
module attributes {stable_mosaic.version = 11 : i64} {
  func.func @mlp_kernel(%arg0: i32, %arg1: memref<16x32xf32, #tpu.memory_space<vmem>>, %arg2: memref<32x256xbf16, #tpu.memory_space<vmem>>, %arg3: memref<1x256xf32, #tpu.memory_space<vmem>>, %arg4: memref<256x512xbf16, #tpu.memory_space<vmem>>, %arg5: memref<1x512xf32, #tpu.memory_space<vmem>>, %arg6: memref<512x128xbf16, #tpu.memory_space<vmem>>, %arg7: memref<1x128xf32, #tpu.memory_space<vmem>>, %arg8: memref<128x8xbf16, #tpu.memory_space<vmem>>, %arg9: memref<16x8xf32, #tpu.memory_space<vmem>>) attributes {dimension_semantics = [#tpu.dimension_semantics<parallel>], iteration_bounds = array<i64: 1>, scalar_prefetch = 0 : i64, scratch_operands = 0 : i64, tpu.core_type = #tpu.core_type<tc>, window_params = [{transform_indices = @transform_0, window_bounds = array<i64: 16, 32>}, {pipeline_mode = #tpu.pipeline_mode<synchronous>, transform_indices = @transform_1, window_bounds = array<i64: 32, 256>}, {pipeline_mode = #tpu.pipeline_mode<synchronous>, transform_indices = @transform_2, window_bounds = array<i64: 1, 256>}, {pipeline_mode = #tpu.pipeline_mode<synchronous>, transform_indices = @transform_3, window_bounds = array<i64: 256, 512>}, {pipeline_mode = #tpu.pipeline_mode<synchronous>, transform_indices = @transform_4, window_bounds = array<i64: 1, 512>}, {pipeline_mode = #tpu.pipeline_mode<synchronous>, transform_indices = @transform_5, window_bounds = array<i64: 512, 128>}, {pipeline_mode = #tpu.pipeline_mode<synchronous>, transform_indices = @transform_6, window_bounds = array<i64: 1, 128>}, {pipeline_mode = #tpu.pipeline_mode<synchronous>, transform_indices = @transform_7, window_bounds = array<i64: 128, 8>}, {transform_indices = @transform_8, window_bounds = array<i64: 16, 8>}]} {
    %c0 = arith.constant 0 : index
    %c0_0 = arith.constant 0 : index
    %0 = vector.load %arg1[%c0, %c0_0] : memref<16x32xf32, #tpu.memory_space<vmem>>, vector<16x32xf32>
    %1 = arith.truncf %0 : vector<16x32xf32> to vector<16x32xbf16>
    %c0_1 = arith.constant 0 : index
    %c0_2 = arith.constant 0 : index
    %2 = vector.load %arg2[%c0_1, %c0_2] : memref<32x256xbf16, #tpu.memory_space<vmem>>, vector<32x256xbf16>
    %cst = arith.constant dense<0.000000e+00> : vector<16x256xf32>
    %3 = tpu.matmul %1, %2, %cst {dimension_numbers = #tpu.dot_dimension_numbers<[1], [0], [0], [1], [0, 0, 1, 1], [], []>} : vector<16x32xbf16>, vector<32x256xbf16>, vector<16x256xf32> -> vector<16x256xf32>
    %c0_3 = arith.constant 0 : index
    %c0_4 = arith.constant 0 : index
    %4 = vector.load %arg3[%c0_3, %c0_4] : memref<1x256xf32, #tpu.memory_space<vmem>>, vector<1x256xf32>
    %5 = vector.broadcast %4 : vector<1x256xf32> to vector<16x256xf32>
    %6 = arith.addf %3, %5 : vector<16x256xf32>
    %cst_5 = arith.constant 0.000000e+00 : f32
    %7 = vector.broadcast %cst_5 : f32 to vector<16x256xf32>
    %8 = arith.maximumf %6, %7 : vector<16x256xf32>
    %9 = arith.truncf %8 : vector<16x256xf32> to vector<16x256xbf16>
    %c0_6 = arith.constant 0 : index
    %c0_7 = arith.constant 0 : index
    %10 = vector.load %arg4[%c0_6, %c0_7] : memref<256x512xbf16, #tpu.memory_space<vmem>>, vector<256x512xbf16>
    %cst_8 = arith.constant dense<0.000000e+00> : vector<16x512xf32>
    %11 = tpu.matmul %9, %10, %cst_8 {dimension_numbers = #tpu.dot_dimension_numbers<[1], [0], [0], [1], [0, 0, 1, 1], [], []>} : vector<16x256xbf16>, vector<256x512xbf16>, vector<16x512xf32> -> vector<16x512xf32>
    %c0_9 = arith.constant 0 : index
    %c0_10 = arith.constant 0 : index
    %12 = vector.load %arg5[%c0_9, %c0_10] : memref<1x512xf32, #tpu.memory_space<vmem>>, vector<1x512xf32>
    %13 = vector.broadcast %12 : vector<1x512xf32> to vector<16x512xf32>
    %14 = arith.addf %11, %13 : vector<16x512xf32>
    %cst_11 = arith.constant 0.000000e+00 : f32
    %15 = vector.broadcast %cst_11 : f32 to vector<16x512xf32>
    %16 = arith.maximumf %14, %15 : vector<16x512xf32>
    %17 = arith.truncf %16 : vector<16x512xf32> to vector<16x512xbf16>
    %c0_12 = arith.constant 0 : index
    %c0_13 = arith.constant 0 : index
    %18 = vector.load %arg6[%c0_12, %c0_13] : memref<512x128xbf16, #tpu.memory_space<vmem>>, vector<512x128xbf16>
    %cst_14 = arith.constant dense<0.000000e+00> : vector<16x128xf32>
    %19 = tpu.matmul %17, %18, %cst_14 {dimension_numbers = #tpu.dot_dimension_numbers<[1], [0], [0], [1], [0, 0, 1, 1], [], []>} : vector<16x512xbf16>, vector<512x128xbf16>, vector<16x128xf32> -> vector<16x128xf32>
    %c0_15 = arith.constant 0 : index
    %c0_16 = arith.constant 0 : index
    %20 = vector.load %arg7[%c0_15, %c0_16] : memref<1x128xf32, #tpu.memory_space<vmem>>, vector<1x128xf32>
    %21 = vector.broadcast %20 : vector<1x128xf32> to vector<16x128xf32>
    %22 = arith.addf %19, %21 : vector<16x128xf32>
    %cst_17 = arith.constant 0.000000e+00 : f32
    %23 = vector.broadcast %cst_17 : f32 to vector<16x128xf32>
    %24 = arith.maximumf %22, %23 : vector<16x128xf32>
    %25 = arith.truncf %24 : vector<16x128xf32> to vector<16x128xbf16>
    %c0_18 = arith.constant 0 : index
    %c0_19 = arith.constant 0 : index
    %26 = vector.load %arg8[%c0_18, %c0_19] : memref<128x8xbf16, #tpu.memory_space<vmem>>, vector<128x8xbf16>
    %cst_20 = arith.constant dense<0.000000e+00> : vector<16x8xf32>
    %27 = tpu.matmul %25, %26, %cst_20 {dimension_numbers = #tpu.dot_dimension_numbers<[1], [0], [0], [1], [0, 0, 1, 1], [], []>} : vector<16x128xbf16>, vector<128x8xbf16>, vector<16x8xf32> -> vector<16x8xf32>
    %c0_21 = arith.constant 0 : index
    %c0_22 = arith.constant 0 : index
    %28 = vector.load %arg9[%c0_21, %c0_22] : memref<16x8xf32, #tpu.memory_space<vmem>>, vector<16x8xf32>
    tpu.vector_store %arg9[%c0_21, %c0_22], %27 {strides = array<i32>} : memref<16x8xf32, #tpu.memory_space<vmem>>, vector<16x8xf32>,
    return
  }
  func.func @transform_0(%arg0: i32) -> (i32, i32) {
    %c0_i32 = arith.constant 0 : i32
    %c0_i32_0 = arith.constant 0 : i32
    return %arg0, %c0_i32 : i32, i32
  }
  func.func @transform_1(%arg0: i32) -> (i32, i32) {
    %c0_i32 = arith.constant 0 : i32
    %c0_i32_0 = arith.constant 0 : i32
    %c0_i32_1 = arith.constant 0 : i32
    return %c0_i32, %c0_i32_0 : i32, i32
  }
  func.func @transform_2(%arg0: i32) -> (i32, i32) {
    %c0_i32 = arith.constant 0 : i32
    %c0_i32_0 = arith.constant 0 : i32
    %c0_i32_1 = arith.constant 0 : i32
    return %c0_i32, %c0_i32_0 : i32, i32
  }
  func.func @transform_3(%arg0: i32) -> (i32, i32) {
    %c0_i32 = arith.constant 0 : i32
    %c0_i32_0 = arith.constant 0 : i32
    %c0_i32_1 = arith.constant 0 : i32
    return %c0_i32, %c0_i32_0 : i32, i32
  }
  func.func @transform_4(%arg0: i32) -> (i32, i32) {
    %c0_i32 = arith.constant 0 : i32
    %c0_i32_0 = arith.constant 0 : i32
    %c0_i32_1 = arith.constant 0 : i32
    return %c0_i32, %c0_i32_0 : i32, i32
  }
  func.func @transform_5(%arg0: i32) -> (i32, i32) {
    %c0_i32 = arith.constant 0 : i32
    %c0_i32_0 = arith.constant 0 : i32
    %c0_i32_1 = arith.constant 0 : i32
    return %c0_i32, %c0_i32_0 : i32, i32
  }
  func.func @transform_6(%arg0: i32) -> (i32, i32) {
    %c0_i32 = arith.constant 0 : i32
    %c0_i32_0 = arith.constant 0 : i32
    %c0_i32_1 = arith.constant 0 : i32
    return %c0_i32, %c0_i32_0 : i32, i32
  }
  func.func @transform_7(%arg0: i32) -> (i32, i32) {
    %c0_i32 = arith.constant 0 : i32
    %c0_i32_0 = arith.constant 0 : i32
    %c0_i32_1 = arith.constant 0 : i32
    return %c0_i32, %c0_i32_0 : i32, i32
  }
  func.func @transform_8(%arg0: i32) -> (i32, i32) {
    %c0_i32 = arith.constant 0 : i32
    %c0_i32_0 = arith.constant 0 : i32
    return %arg0, %c0_i32 : i32, i32
  }
}

</mosaic_0001>

<bundles_post_ra>
// kernel: mlp_forward.1
= control target key start
LH: loop header
LB: loop body
LE: loop exit
PB: predicated region body
PF: predicated region fallthrough
CT: control target
= control target key end

     0   :  { %13 = vsyncpa [#allocation3], 0  ;;  %s1656_s0 = inlined_call_operand.vmem [shape: f32[16,32], index: 0, kind: input, shape index: {}]   ;;  %s1657_s1 = inlined_call_operand.vmem [shape: bf16[32,256], index: 1, kind: input, shape index: {}]   ;;  %s1658_s2 = inlined_call_operand.vmem [shape: f32[1,256], index: 2, kind: input, shape index: {}]   ;;  %s1659_s3 = inlined_call_operand.hbm [shape: bf16[256,512], index: 3, kind: input, shape index: {}]   ;;  %s1660_s4 = inlined_call_operand.vmem [shape: f32[1,512], index: 4, kind: input, shape index: {}]   ;;  %s1661_s5 = inlined_call_operand.hbm [shape: bf16[512,128], index: 5, kind: input, shape index: {}]   ;;  %s1662_s6 = inlined_call_operand.vmem [shape: f32[1,128], index: 6, kind: input, shape index: {}]   ;;  %s1663_s7 = inlined_call_operand.vmem [shape: bf16[128,8], index: 7, kind: input, shape index: {}]   ;;  %s1664_s8 = inlined_call_operand.vmem [shape: f32[16,8], index: 8, kind: output, shape index: {}]  }
   0x1   :  { %14 = vsyncpa [#allocation5], 0  ;;  %s1498_s27 = smov [#allocation2]   ;;  %s1450_s9 = scalar_lea.hbm %s1659_s3, 8192 }
   0x2   :  { %s26_s28 = sshll.u32 %s1498_s27, 4  ;;  %p1451_p0 = scmp.ne.s32.totalorder %s1659_s3, %s1450_s9  ;;  %s27_s28 = int_to_ptr.vmem [resolvable:$true] %s26_s28 }
   0x3   :  { %p1454_p1 = scmp.lt.u32.totalorder %s1450_s9, %s1659_s3 }
   0x5   :  { %p1456_p2 = pnand %p1454_p1, %p1451_p0 }
   0x7   :  { %1459 = shalt.err (!%p1456_p2)
}
   0x8   :  { %s1460_s14 = scalar_lea.vmem %s27_s28, 8192  ;;  %p1465_p4 = scmp.lt.s32.totalorder %s27_s28, %s27_s28 }
   0x9   :  { %p1461_p3 = scmp.ne.s32.totalorder %s27_s28, %s1460_s14  ;;  %p1466_p5 = scmp.lt.s32.totalorder %s1460_s14, %s1460_s14 }
   0xb   :  { %p1467_p6 = por %p1466_p5, %p1465_p4 }
   0xd   :  { %p1468_p7 = pnand %p1467_p6, %p1461_p3 }
   0xf   :  { %1471 = shalt.err (!%p1468_p7)
}
  0x10   :  { %s1499_s15 = smov 256   ;;  %s1500_s16 = smov 16  }
  0x11   :  { %32 = dma.hbm_to_vmem [thread:$0]  %s1659_s3, 8192, %s27_s28, [#allocation3], %s1499_s15, %s1499_s15, %s1500_s16  }
  0x12   :  { %s1501_s19 = smov [#allocation4]   ;;  %s1472_s23 = scalar_lea.hbm %s1661_s5, 4096 }
  0x13   :  { %s40_s20 = sshll.u32 %s1501_s19, 4  ;;  %p1473_p8 = scmp.ne.s32.totalorder %s1661_s5, %s1472_s23  ;;  %s41_s20 = int_to_ptr.vmem [resolvable:$true] %s40_s20 }
  0x14   :  { %p1476_p9 = scmp.lt.u32.totalorder %s1472_s23, %s1661_s5 }
  0x16   :  { %p1478_p10 = pnand %p1476_p9, %p1473_p8 }
  0x18   :  { %1481 = shalt.err (!%p1478_p10)
}
  0x19   :  { %s1482_s29 = scalar_lea.vmem %s41_s20, 4096  ;;  %p1487_p12 = scmp.lt.s32.totalorder %s41_s20, %s41_s20 }
  0x1a   :  { %p1483_p11 = scmp.ne.s32.totalorder %s41_s20, %s1482_s29  ;;  %p1488_p13 = scmp.lt.s32.totalorder %s1482_s29, %s1482_s29 }
  0x1c   :  { %p1489_p0 = por %p1488_p13, %p1487_p12 }
  0x1e   :  { %p1490_p1 = pnand %p1489_p0, %p1483_p11 }
  0x20   :  { %1493 = shalt.err (!%p1490_p1)
}
  0x21   :  { %s1502_s3 = smov 64   ;;  %s1503_s28 = smov 4  }
  0x22   :  { %46 = dma.hbm_to_vmem [thread:$0]  %s1661_s5, 4096, %s41_s20, [#allocation5], %s1502_s3, %s1502_s3, %s1503_s28  }
  0x23   :  { %1494 = dma.done.wait [#allocation3], 8192  }
  0x24   :  { %1495 = vsyncadd [#allocation3], 4294959104 }
  0x25   :  { %1496 = dma.done.wait [#allocation5], 4096  }
  0x26   :  { %1497 = vsyncadd [#allocation5], 4294963200  ;;  %v1504_v0 = vmov 0   ;;  %v1308_v1 = vld [vmem:[%s1657_s1 + $0x4] ss:$8 sps:$4 sm:$0xff]   ;;  %vm97_vm0 = vcmask 261120  }
  0x27   :  { %133 = vmatprep.mubr.bf16.mxu0 %v1504_v0  ;;  %v1310_v2 = vld [vmem:[%s1657_s1] ss:$8 sps:$4 sm:$0xff]   ;;  %101 = vmatprep.subr.bf16.mxu0 %v1308_v1  ;;  %v1311_v3 = vld [vmem:[%s1657_s1 + $0x14] ss:$8 sps:$4 sm:$0xff]   ;;  %v1313_v4 = vld [vmem:[%s1657_s1 + $0x10] ss:$8 sps:$4 sm:$0xff]  }
  0x28   :  { %v58_v5 = vld [vmem:[%s1656_s0] sm:$0xff]  ;;  %102 = vmatpush1.bf16.msra.mxu0 %v1310_v2  ;;  %v59_v6 = vld [vmem:[%s1656_s0 + $0x8] sm:$0xff]  ;;  %vm1506_vm1 = vmmov 0   ;;  %vm1107_vm2 = vcmask 64512  }
  0x29   :  { %103 = vmatprep.subr.bf16.mxu0 %v1311_v3  ;;  %v1314_v7 = vld [vmem:[#allocation2 + $0x4] ss:$16 sps:$4 sm:$0xff]   ;;  %v1318_v8 = vld [vmem:[#allocation2 + $0xc] ss:$16 sps:$4 sm:$0xff]   ;;  %v1319_v9 = vld [vmem:[#allocation2] ss:$16 sps:$4 sm:$0xff]   ;;  %v60_v10 = vpack.c.bf16 %v59_v6, %v58_v5 }
  0x2a   :  { %556 = vmatprep.subr.bf16.mxu1 %v1314_v7  ;;  %v1320_v11 = vld [vmem:[#allocation2 + $0x24] ss:$16 sps:$4 sm:$0xff]   ;;  %v1316_v12 = vld [vmem:[#allocation2 + $0x8] ss:$16 sps:$4 sm:$0xff]   ;;  %v1324_v13 = vld [vmem:[#allocation2 + $0x2c] ss:$16 sps:$4 sm:$0xff]  }
  0x2b   :  { %557 = vmatpush1.bf16.msra.mxu1 %v1319_v9  ;;  %v1325_v14 = vld [vmem:[#allocation2 + $0x20] ss:$16 sps:$4 sm:$0xff]   ;;  %v1326_v15 = vld [vmem:[#allocation2 + $0x44] ss:$16 sps:$4 sm:$0xff]   ;;  %v1322_v16 = vld [vmem:[#allocation2 + $0x28] ss:$16 sps:$4 sm:$0xff]  }
  0x2c   :  { %104 = vmatpush1.bf16.msra.mxu0 %v1313_v4  ;;  %558 = vmatprep.subr.bf16.mxu1 %v1320_v11  ;;  %v1330_v17 = vld [vmem:[#allocation2 + $0x4c] ss:$16 sps:$4 sm:$0xff]   ;;  %v1331_v18 = vld [vmem:[#allocation2 + $0x40] ss:$16 sps:$4 sm:$0xff]   ;;  %v1332_v19 = vld [vmem:[#allocation2 + $0x64] ss:$16 sps:$4 sm:$0xff]  }
  0x2d   :  { %599 = vmatprep.subr.bf16.mxu0 %v1318_v8  ;;  %v1328_v20 = vld [vmem:[#allocation2 + $0x48] ss:$16 sps:$4 sm:$0xff]   ;;  %v1337_v21 = vld [vmem:[#allocation2 + $0x60] ss:$16 sps:$4 sm:$0xff]   ;;  %v1336_v22 = vld [vmem:[#allocation2 + $0x6c] ss:$16 sps:$4 sm:$0xff]  }
  0x2e   :  { %v1338_v23 = vld [vmem:[#allocation2 + $0x84] ss:$16 sps:$4 sm:$0xff]   ;;  %v1334_v24 = vld [vmem:[#allocation2 + $0x68] ss:$16 sps:$4 sm:$0xff]   ;;  %v1342_v25 = vld [vmem:[#allocation2 + $0x8c] ss:$16 sps:$4 sm:$0xff]  }
  0x2f   :  { %1120 = vmatmul.mubr.msk.bf16.vlgmr.msra.gmra.mrb[0].mxu0 %vm97_vm0, %v60_v10  ;;  %559 = vmatpush1.bf16.msra.mxu1 %v1325_v14  ;;  %v1343_v26 = vld [vmem:[#allocation2 + $0x80] ss:$16 sps:$4 sm:$0xff]   ;;  %v1344_v27 = vld [vmem:[#allocation2 + $0xa4] ss:$16 sps:$4 sm:$0xff]   ;;  %v1340_v28 = vld [vmem:[#allocation2 + $0x88] ss:$16 sps:$4 sm:$0xff]   ;;  %v67_v10 = vlaneseq }
  0x30   :  { %600 = vmatpush1.bf16.msra.mxu0 %v1316_v12  ;;  %560 = vmatprep.subr.bf16.mxu1 %v1326_v15  ;;  %v1349_v29 = vld [vmem:[#allocation2 + $0xa0] ss:$16 sps:$4 sm:$0xff]   ;;  %v1348_v30 = vld [vmem:[#allocation2 + $0xac] ss:$16 sps:$4 sm:$0xff]   ;;  %v1350_v31 = vld [vmem:[#allocation2 + $0xc4] ss:$16 sps:$4 sm:$0xff]  }
  0x31   :  { %601 = vmatprep.subr.bf16.mxu0 %v1324_v13  ;;  %v1346_v32 = vld [vmem:[#allocation2 + $0xa8] ss:$16 sps:$4 sm:$0xff]   ;;  %v1354_v33 = vld [vmem:[#allocation2 + $0xcc] ss:$16 sps:$4 sm:$0xff]   ;;  %v1355_v34 = vld [vmem:[#allocation2 + $0xc0] ss:$16 sps:$4 sm:$0xff]  }
  0x32   :  { %v1356_v35 = vld [vmem:[#allocation2 + $0xe4] ss:$16 sps:$4 sm:$0xff]   ;;  %v1352_v36 = vld [vmem:[#allocation2 + $0xc8] ss:$16 sps:$4 sm:$0xff]   ;;  %v1361_v37 = vld [vmem:[#allocation2 + $0xe0] ss:$16 sps:$4 sm:$0xff]  }
  0x33   :  { %561 = vmatpush1.bf16.msra.mxu1 %v1331_v18  ;;  %v1360_v38 = vld [vmem:[#allocation2 + $0xec] ss:$16 sps:$4 sm:$0xff]   ;;  %v1362_v39 = vld [vmem:[#allocation2 + $0x104] ss:$16 sps:$4 sm:$0xff]   ;;  %v1358_v40 = vld [vmem:[#allocation2 + $0xe8] ss:$16 sps:$4 sm:$0xff]  }
  0x34   :  { %602 = vmatpush1.bf16.msra.mxu0 %v1322_v16  ;;  %562 = vmatprep.subr.bf16.mxu1 %v1332_v19  ;;  %v1366_v41 = vld [vmem:[#allocation2 + $0x10c] ss:$16 sps:$4 sm:$0xff]   ;;  %v1367_v42 = vld [vmem:[#allocation2 + $0x100] ss:$16 sps:$4 sm:$0xff]   ;;  %v1368_v43 = vld [vmem:[#allocation2 + $0x124] ss:$16 sps:$4 sm:$0xff]  }
  0x35   :  { %603 = vmatprep.subr.bf16.mxu0 %v1330_v17  ;;  %v1364_v44 = vld [vmem:[#allocation2 + $0x108] ss:$16 sps:$4 sm:$0xff]   ;;  %v1373_v45 = vld [vmem:[#allocation2 + $0x120] ss:$16 sps:$4 sm:$0xff]   ;;  %v1372_v46 = vld [vmem:[#allocation2 + $0x12c] ss:$16 sps:$4 sm:$0xff]  }
  0x36   :  { %v1374_v47 = vld [vmem:[#allocation2 + $0x144] ss:$16 sps:$4 sm:$0xff]   ;;  %v1370_v48 = vld [vmem:[#allocation2 + $0x128] ss:$16 sps:$4 sm:$0xff]   ;;  %v1379_v49 = vld [vmem:[#allocation2 + $0x140] ss:$16 sps:$4 sm:$0xff]  }
  0x37   :  { %563 = vmatpush1.bf16.msra.mxu1 %v1337_v21  ;;  %v1378_v50 = vld [vmem:[#allocation2 + $0x14c] ss:$16 sps:$4 sm:$0xff]   ;;  %v1380_v51 = vld [vmem:[#allocation2 + $0x164] ss:$16 sps:$4 sm:$0xff]   ;;  %v1376_v52 = vld [vmem:[#allocation2 + $0x148] ss:$16 sps:$4 sm:$0xff]  }
  0x38   :  { %604 = vmatpush1.bf16.msra.mxu0 %v1328_v20  ;;  %564 = vmatprep.subr.bf16.mxu1 %v1338_v23  ;;  %v1385_v53 = vld [vmem:[#allocation2 + $0x160] ss:$16 sps:$4 sm:$0xff]   ;;  %v1384_v54 = vld [vmem:[#allocation2 + $0x16c] ss:$16 sps:$4 sm:$0xff]   ;;  %v1386_v55 = vld [vmem:[#allocation2 + $0x184] ss:$16 sps:$4 sm:$0xff]  }
  0x39   :  { %605 = vmatprep.subr.bf16.mxu0 %v1336_v22  ;;  %v1382_v56 = vld [vmem:[#allocation2 + $0x168] ss:$16 sps:$4 sm:$0xff]   ;;  %v1391_v57 = vld [vmem:[#allocation2 + $0x180] ss:$16 sps:$4 sm:$0xff]   ;;  %v1390_v58 = vld [vmem:[#allocation2 + $0x18c] ss:$16 sps:$4 sm:$0xff]  }
  0x3a   :  { %v1392_v59 = vld [vmem:[#allocation2 + $0x1a4] ss:$16 sps:$4 sm:$0xff]   ;;  %v1388_v60 = vld [vmem:[#allocation2 + $0x188] ss:$16 sps:$4 sm:$0xff]   ;;  %v1396_v61 = vld [vmem:[#allocation2 + $0x1ac] ss:$16 sps:$4 sm:$0xff]  }
  0x3b   :  { %565 = vmatpush1.bf16.msra.mxu1 %v1343_v26  ;;  %v1394_v62 = vld [vmem:[#allocation2 + $0x1a8] ss:$16 sps:$4 sm:$0xff]   ;;  %v1397_v63 = vld [vmem:[#allocation2 + $0x1a0] ss:$16 sps:$4 sm:$0xff]   ;;  %v1398_v0 = vld [vmem:[#allocation2 + $0x1c4] ss:$16 sps:$4 sm:$0xff]  }
  0x3c   :  { %606 = vmatpush1.bf16.msra.mxu0 %v1334_v24  ;;  %566 = vmatprep.subr.bf16.mxu1 %v1344_v27  ;;  %v1402_v1 = vld [vmem:[#allocation2 + $0x1cc] ss:$16 sps:$4 sm:$0xff]   ;;  %v1400_v2 = vld [vmem:[#allocation2 + $0x1c8] ss:$16 sps:$4 sm:$0xff]   ;;  %v1403_v3 = vld [vmem:[#allocation2 + $0x1c0] ss:$16 sps:$4 sm:$0xff]  }
  0x3d   :  { %607 = vmatprep.subr.bf16.mxu0 %v1342_v25  ;;  %v1404_v4 = vld [vmem:[#allocation2 + $0x1e4] ss:$16 sps:$4 sm:$0xff]   ;;  %v1408_v5 = vld [vmem:[#allocation2 + $0x1ec] ss:$16 sps:$4 sm:$0xff]   ;;  %v1406_v6 = vld [vmem:[#allocation2 + $0x1e8] ss:$16 sps:$4 sm:$0xff]  }
  0x3e   :  { %v1409_v7 = vld [vmem:[#allocation2 + $0x1e0] ss:$16 sps:$4 sm:$0xff]   ;;  %v1594_v11 = vshrl.u32 %v67_v10, 7 }
  0x3f   :  { %567 = vmatpush1.bf16.msra.mxu1 %v1349_v29  ;;  %v1410_v8 = vld [vmem:[#allocation4 + $0x40] sm:$0xff]  }
  0x40   :  { %608 = vmatpush1.bf16.msra.mxu0 %v1340_v28  ;;  %568 = vmatprep.subr.bf16.mxu1 %v1350_v31  ;;  %v1411_v9 = vld [vmem:[#allocation4 + $0xc0] sm:$0xff]   ;;  %v69_v12 = vsub.s32 0, %v1594_v11  ;;  %v73_v14 = vsub.s32 1, %v1594_v11 }
  0x41   :  { %609 = vmatprep.subr.bf16.mxu0 %v1348_v30  ;;  %v65_v13 = vld [vmem:[%s1658_s2] sm:$0x3] }
  0x42   :  { %v70_v15 = vrot.slane %v65_v13, %v69_v12  ;;  %v74_v16 = vrot.slane %v65_v13, %v73_v14  ;;  %v1412_v31 = vld [vmem:[#allocation4] sm:$0xff]  }
  0x43   :  { %569 = vmatpush1.bf16.msra.mxu1 %v1355_v34  ;;  %v1415_v34 = vld [vmem:[#allocation4 + $0xc8] sm:$0xff]  }
  0x44   :  { %610 = vmatpush1.bf16.msra.mxu0 %v1346_v32  ;;  %570 = vmatprep.subr.bf16.mxu1 %v1356_v35  ;;  %v1413_v32 = vld [vmem:[#allocation4 + $0x80] sm:$0xff]   ;;  %v1416_v35 = vld [vmem:[#allocation4 + $0x8] sm:$0xff]  }
  0x45   :  { %611 = vmatprep.subr.bf16.mxu0 %v1354_v33  ;;  %v1414_v33 = vld [vmem:[#allocation4 + $0x48] sm:$0xff]  }
  0x47   :  { %571 = vmatpush1.bf16.msra.mxu1 %v1361_v37  ;;  %v1418_v37 = vld [vmem:[#allocation4 + $0x50] sm:$0xff]  }
  0x48   :  { %612 = vmatpush1.bf16.msra.mxu0 %v1352_v36  ;;  %572 = vmatprep.subr.bf16.mxu1 %v1362_v39  ;;  %v1417_v36 = vld [vmem:[#allocation4 + $0x88] sm:$0xff]   ;;  %v1420_v39 = vld [vmem:[#allocation4 + $0x10] sm:$0xff]  }
  0x49   :  { %613 = vmatprep.subr.bf16.mxu0 %v1360_v38  ;;  %v1419_v38 = vld [vmem:[#allocation4 + $0xd0] sm:$0xff]  }
  0x4b   :  { %573 = vmatpush1.bf16.msra.mxu1 %v1367_v42  ;;  %v1423_v42 = vld [vmem:[#allocation4 + $0xd8] sm:$0xff]  }
  0x4c   :  { %614 = vmatpush1.bf16.msra.mxu0 %v1358_v40  ;;  %574 = vmatprep.subr.bf16.mxu1 %v1368_v43  ;;  %v1421_v40 = vld [vmem:[#allocation4 + $0x90] sm:$0xff]   ;;  %v1424_v43 = vld [vmem:[#allocation4 + $0x18] sm:$0xff]  }
  0x4d   :  { %615 = vmatprep.subr.bf16.mxu0 %v1366_v41  ;;  %v1422_v41 = vld [vmem:[#allocation4 + $0x58] sm:$0xff]  }
  0x4f   :  { %575 = vmatpush1.bf16.msra.mxu1 %v1373_v45  ;;  %v1426_v45 = vld [vmem:[#allocation4 + $0x60] sm:$0xff]  }
  0x50   :  { %616 = vmatpush1.bf16.msra.mxu0 %v1364_v44  ;;  %576 = vmatprep.subr.bf16.mxu1 %v1374_v47  ;;  %v1425_v44 = vld [vmem:[#allocation4 + $0x98] sm:$0xff]   ;;  %v1428_v47 = vld [vmem:[#allocation4 + $0x20] sm:$0xff]  }
  0x51   :  { %617 = vmatprep.subr.bf16.mxu0 %v1372_v46  ;;  %v1427_v46 = vld [vmem:[#allocation4 + $0xe0] sm:$0xff]  }
  0x53   :  { %577 = vmatpush1.bf16.msra.mxu1 %v1379_v49  ;;  %v1430_v49 = vld [vmem:[#allocation4 + $0x68] sm:$0xff]  }
  0x54   :  { %618 = vmatpush1.bf16.msra.mxu0 %v1370_v48  ;;  %578 = vmatprep.subr.bf16.mxu1 %v1380_v51  ;;  %v1429_v48 = vld [vmem:[#allocation4 + $0xa0] sm:$0xff]   ;;  %v1432_v51 = vld [vmem:[#allocation4 + $0x28] sm:$0xff]  }
  0x55   :  { %619 = vmatprep.subr.bf16.mxu0 %v1378_v50  ;;  %v1431_v50 = vld [vmem:[#allocation4 + $0xe8] sm:$0xff]  }
  0x57   :  { %579 = vmatpush1.bf16.msra.mxu1 %v1385_v53  ;;  %v1434_v53 = vld [vmem:[#allocation4 + $0x70] sm:$0xff]  }
  0x58   :  { %620 = vmatpush1.bf16.msra.mxu0 %v1376_v52  ;;  %580 = vmatprep.subr.bf16.mxu1 %v1386_v55  ;;  %v1433_v52 = vld [vmem:[#allocation4 + $0xa8] sm:$0xff]   ;;  %v1436_v55 = vld [vmem:[#allocation4 + $0x30] sm:$0xff]  }
  0x59   :  { %621 = vmatprep.subr.bf16.mxu0 %v1384_v54  ;;  %v1435_v54 = vld [vmem:[#allocation4 + $0xf0] sm:$0xff]  }
  0x5b   :  { %581 = vmatpush1.bf16.msra.mxu1 %v1391_v57  ;;  %v1438_v57 = vld [vmem:[#allocation4 + $0x78] sm:$0xff]  }
  0x5c   :  { %622 = vmatpush1.bf16.msra.mxu0 %v1382_v56  ;;  %582 = vmatprep.subr.bf16.mxu1 %v1392_v59  ;;  %v1437_v56 = vld [vmem:[#allocation4 + $0xb0] sm:$0xff]   ;;  %v1440_v59 = vld [vmem:[#allocation4 + $0x38] sm:$0xff]  }
  0x5d   :  { %623 = vmatprep.subr.bf16.mxu0 %v1390_v58  ;;  %v1439_v58 = vld [vmem:[#allocation4 + $0xf8] sm:$0xff]  }
  0x5f   :  { %583 = vmatpush1.bf16.msra.mxu1 %v1397_v63  ;;  %v214_v63 = vld [vmem:[%s1660_s4] sm:$0xf] }
  0x60   :  { %624 = vmatpush1.bf16.msra.mxu0 %v1388_v60  ;;  %584 = vmatprep.subr.bf16.mxu1 %v1398_v0  ;;  %v1441_v60 = vld [vmem:[#allocation4 + $0xb8] sm:$0xff]   ;;  %v230_v0 = vsub.s32 3, %v1594_v11 }
  0x61   :  { %625 = vmatprep.subr.bf16.mxu0 %v1396_v61  ;;  %v1505_v61 = vmov 0.0  }
  0x63   :  { %585 = vmatpush1.bf16.msra.mxu1 %v1403_v3  ;;  %v223_v3 = vrot.slane %v214_v63, %v73_v14 }
  0x64   :  { %626 = vmatpush1.bf16.msra.mxu0 %v1394_v62  ;;  %586 = vmatprep.subr.bf16.mxu1 %v1404_v4  ;;  %v226_v62 = vsub.s32 2, %v1594_v11  ;;  %v231_v4 = vrot.slane %v214_v63, %v230_v0 }
  0x65   :  { %627 = vmatprep.subr.bf16.mxu0 %v1402_v1  ;;  %v219_v1 = vrot.slane %v214_v63, %v69_v12 }
  0x67   :  { %587 = vmatpush1.bf16.msra.mxu1 %v1409_v7 }
  0x68   :  { %628 = vmatpush1.bf16.msra.mxu0 %v1400_v2  ;;  %1226 = vmatprep.subr.bf16.mxu1 %v1410_v8  ;;  %v227_v2 = vrot.slane %v214_v63, %v226_v62 }
  0x69   :  { %629 = vmatprep.subr.bf16.mxu0 %v1408_v5 }
  0x6c   :  { %630 = vmatpush1.bf16.msra.mxu0 %v1406_v6 }
  0x6d   :  { %1248 = vmatprep.subr.bf16.mxu0 %v1411_v9 }
 0x102   :  { %v135_v17 = vpop.f32.mrb[0].mxu0 }
 0x103   :  { %v136_v18 = vadd.f32 %v135_v17, %v70_v15  ;;  %v137_v19 = vpop.f32.mrb[1].mxu0 }
 0x104   :  { %v138_v20 = vadd.f32 %v137_v19, %v74_v16  ;;  %v139_v21 = vpop.f32.mrb[2].mxu0 }
 0x105   :  { %v140_v22 = vadd.f32 %v139_v21, %v70_v15  ;;  %v141_v23 = vpop.f32.mrb[3].mxu0  ;;  %v144_v25 = vmax.f32 %v136_v18, 0.0 }
 0x106   :  { %v142_v24 = vadd.f32 %v141_v23, %v74_v16  ;;  %v145_v27 = vmax.f32 %v138_v20, 0.0 }
 0x107   :  { %v146_v26 = vmax.f32 %v140_v22, 0.0 }
 0x108   :  { %v147_v28 = vmax.f32 %v142_v24, 0.0 }
 0x109   :  { %v148_v29 = vpack.c.bf16 %v146_v26, %v144_v25 }
 0x10a   :  { %v149_v30 = vpack.c.bf16 %v147_v28, %v145_v27 }
 0x10c   :  { %588 = vmatprep.mubr.bf16.mxu1 %v149_v30  ;;  %631 = vmatprep.mubr.bf16.mxu0 %v149_v30 }
 0x10d   :  { %589 = vmatmul.mubr.bf16.vlgmr.msra.gmra.mrb[0].mxu1 %v148_v29  ;;  %632 = vmatmul.mubr.bf16.vlgmr.msra.gmra.mrb[4].mxu0 %v148_v29 }
 0x10e   :  { %1227 = vmatpush3.bf16.msra.mxu1 %v1412_v31  ;;  %1249 = vmatpush3.bf16.msra.mxu0 %v1413_v32 }
 0x10f   :  { %1228 = vmatprep.subr.bf16.mxu1 %v1414_v33  ;;  %1250 = vmatprep.subr.bf16.mxu0 %v1415_v34  ;;  %v1442_v33 = vld [vmem:[%s1663_s7] sm:$0xff]   ;;  %v1443_v34 = vld [vmem:[%s1663_s7 + $0x8] sm:$0xff]  }
 0x112   :  { %1229 = vmatpush3.bf16.msra.mxu1 %v1416_v35  ;;  %1251 = vmatpush3.bf16.msra.mxu0 %v1417_v36  ;;  %v1444_v35 = vld [vmem:[%s1663_s7 + $0x10] sm:$0xff]   ;;  %v1445_v36 = vld [vmem:[%s1663_s7 + $0x18] sm:$0xff]  }
 0x113   :  { %1230 = vmatprep.subr.bf16.mxu1 %v1418_v37  ;;  %1252 = vmatprep.subr.bf16.mxu0 %v1419_v38  ;;  %v1446_v37 = vld [vmem:[%s1663_s7 + $0x20] sm:$0xff]   ;;  %v1447_v38 = vld [vmem:[%s1663_s7 + $0x28] sm:$0xff]  }
 0x116   :  { %1231 = vmatpush3.bf16.msra.mxu1 %v1420_v39  ;;  %1253 = vmatpush3.bf16.msra.mxu0 %v1421_v40  ;;  %v1448_v39 = vld [vmem:[%s1663_s7 + $0x30] sm:$0xff]   ;;  %v1449_v40 = vld [vmem:[%s1663_s7 + $0x38] sm:$0xff]  }
 0x117   :  { %1232 = vmatprep.subr.bf16.mxu1 %v1422_v41  ;;  %1254 = vmatprep.subr.bf16.mxu0 %v1423_v42 }
 0x11a   :  { %1233 = vmatpush3.bf16.msra.mxu1 %v1424_v43  ;;  %1255 = vmatpush3.bf16.msra.mxu0 %v1425_v44  ;;  %v1185_v43 = vld [vmem:[%s1662_s6] ss:$0 sm:$0xff] }
 0x11b   :  { %1234 = vmatprep.subr.bf16.mxu1 %v1426_v45  ;;  %1256 = vmatprep.subr.bf16.mxu0 %v1427_v46 }
 0x11e   :  { %1235 = vmatpush3.bf16.msra.mxu1 %v1428_v47  ;;  %1257 = vmatpush3.bf16.msra.mxu0 %v1429_v48 }
 0x11f   :  { %1236 = vmatprep.subr.bf16.mxu1 %v1430_v49  ;;  %1258 = vmatprep.subr.bf16.mxu0 %v1431_v50 }
 0x122   :  { %1237 = vmatpush3.bf16.msra.mxu1 %v1432_v51  ;;  %1259 = vmatpush3.bf16.msra.mxu0 %v1433_v52 }
 0x123   :  { %1238 = vmatprep.subr.bf16.mxu1 %v1434_v53  ;;  %1260 = vmatprep.subr.bf16.mxu0 %v1435_v54 }
 0x126   :  { %1239 = vmatpush3.bf16.msra.mxu1 %v1436_v55  ;;  %1261 = vmatpush3.bf16.msra.mxu0 %v1437_v56 }
 0x127   :  { %1240 = vmatprep.subr.bf16.mxu1 %v1438_v57  ;;  %1262 = vmatprep.subr.bf16.mxu0 %v1439_v58 }
 0x12a   :  { %1241 = vmatpush3.bf16.msra.mxu1 %v1440_v59  ;;  %1263 = vmatpush3.bf16.msra.mxu0 %v1441_v60 }
 0x12b   :  { %1279 = vmatprep.subr.bf16.mxu1 %v1505_v61 }
 0x1e0   :  { %v590_v5 = vpop.f32.mrb[0].mxu1  ;;  %v633_v6 = vpop.f32.mrb[4].mxu0 }
 0x1e1   :  { %v591_v7 = vadd.f32 %v590_v5, %v219_v1  ;;  %v634_v8 = vadd.f32 %v633_v6, %v227_v2  ;;  %v592_v9 = vpop.f32.mrb[1].mxu1  ;;  %v635_v10 = vpop.f32.mrb[5].mxu0 }
 0x1e2   :  { %v593_v13 = vadd.f32 %v592_v9, %v223_v3  ;;  %v636_v15 = vadd.f32 %v635_v10, %v231_v4  ;;  %v594_v16 = vpop.f32.mrb[2].mxu1  ;;  %v637_v17 = vpop.f32.mrb[6].mxu0 }
 0x1e3   :  { %v595_v18 = vadd.f32 %v594_v16, %v219_v1  ;;  %v638_v19 = vadd.f32 %v637_v17, %v227_v2  ;;  %v596_v20 = vpop.f32.mrb[3].mxu1  ;;  %v639_v21 = vpop.f32.mrb[7].mxu0  ;;  %v642_v23 = vmax.f32 %v591_v7, 0.0  ;;  %v644_v11 = vmax.f32 %v634_v8, 0.0 }
 0x1e4   :  { %v597_v12 = vadd.f32 %v596_v20, %v223_v3  ;;  %v640_v22 = vadd.f32 %v639_v21, %v231_v4  ;;  %v643_v25 = vmax.f32 %v593_v13, 0.0  ;;  %v645_v26 = vmax.f32 %v636_v15, 0.0 }
 0x1e5   :  { %v646_v14 = vmax.f32 %v595_v18, 0.0  ;;  %v648_v24 = vmax.f32 %v638_v19, 0.0 }
 0x1e6   :  { %v647_v27 = vmax.f32 %v597_v12, 0.0  ;;  %v649_v28 = vmax.f32 %v640_v22, 0.0 }
 0x1e7   :  { %v650_v29 = vpack.c.bf16 %v646_v14, %v642_v23  ;;  %v652_v30 = vpack.c.bf16 %v648_v24, %v644_v11 }
 0x1e8   :  { %v651_v31 = vpack.c.bf16 %v647_v27, %v643_v25  ;;  %v653_v32 = vpack.c.bf16 %v649_v28, %v645_v26 }
 0x1ea   :  { %949 = vmatprep.mubr.bf16.mxu1 %v651_v31  ;;  %990 = vmatprep.mubr.bf16.mxu0 %v653_v32 }
 0x1eb   :  { %950 = vmatmul.mubr.bf16.vlgmr.msra.gmra.mrb[4].mxu1 %v650_v29  ;;  %991 = vmatmul.mubr.bf16.vlgmr.msra.gmra.mrb[8].mxu0 %v652_v30 }
 0x1ec   :  { %1280 = vmatpush3.bf16.msra.mxu1 %v1442_v33  ;;  %1295 = vmatprep.mubr.msk.bf16.mxu1 %vm1506_vm1, %v1505_v61 }
 0x1ed   :  { %1281 = vmatprep.subr.bf16.mxu1 %v1505_v61 }
 0x1f0   :  { %1282 = vmatpush3.bf16.msra.mxu1 %v1443_v34 }
 0x1f1   :  { %1283 = vmatprep.subr.bf16.mxu1 %v1505_v61 }
 0x1f4   :  { %1284 = vmatpush3.bf16.msra.mxu1 %v1444_v35 }
 0x1f5   :  { %1285 = vmatprep.subr.bf16.mxu1 %v1505_v61 }
 0x1f8   :  { %1286 = vmatpush3.bf16.msra.mxu1 %v1445_v36 }
 0x1f9   :  { %1287 = vmatprep.subr.bf16.mxu1 %v1505_v61 }
 0x1fc   :  { %1288 = vmatpush3.bf16.msra.mxu1 %v1446_v37 }
 0x1fd   :  { %1289 = vmatprep.subr.bf16.mxu1 %v1505_v61 }
 0x200   :  { %1290 = vmatpush3.bf16.msra.mxu1 %v1447_v38 }
 0x201   :  { %1291 = vmatprep.subr.bf16.mxu1 %v1505_v61 }
 0x204   :  { %1292 = vmatpush3.bf16.msra.mxu1 %v1448_v39 }
 0x205   :  { %1293 = vmatprep.subr.bf16.mxu1 %v1505_v61 }
 0x208   :  { %1294 = vmatpush3.bf16.msra.mxu1 %v1449_v40 }
 0x2be   :  { %v1242_v41 = vpop.f32.mrb[4].mxu1  ;;  %v1264_v42 = vpop.f32.mrb[8].mxu0 }
 0x2bf   :  { %v1243_v44 = vpop.f32.mrb[5].mxu1  ;;  %v1265_v45 = vpop.f32.mrb[9].mxu0 }
 0x2c0   :  { %v1244_v46 = vadd.f32 %v1243_v44, %v1242_v41  ;;  %v1266_v47 = vadd.f32 %v1265_v45, %v1264_v42  ;;  %v1245_v48 = vpop.f32.mrb[6].mxu1  ;;  %v1267_v49 = vpop.f32.mrb[10].mxu0 }
 0x2c1   :  { %v1246_v50 = vpop.f32.mrb[7].mxu1  ;;  %v1268_v51 = vpop.f32.mrb[11].mxu0 }
 0x2c2   :  { %v952_v52 = vadd.f32 %v1244_v46, %v1185_v43  ;;  %v1247_v53 = vadd.f32 %v1246_v50, %v1245_v48  ;;  %v1269_v54 = vadd.f32 %v1268_v51, %v1267_v49 }
 0x2c4   :  { %v993_v55 = vadd.f32 %v1266_v47, %v952_v52  ;;  %v955_v56 = vadd.f32 %v1247_v53, %v1185_v43 }
 0x2c6   :  { %v996_v57 = vadd.f32 %v1269_v54, %v955_v56  ;;  %v999_v58 = vmax.f32 %v993_v55, 0.0 }
 0x2c8   :  { %v1000_v59 = vmax.f32 %v996_v57, 0.0 }
 0x2ca   :  { %v1001_v60 = vpack.c.bf16 %v1000_v59, %v999_v58 }
 0x2cc   :  { %1296 = vmatmul.mubr.bf16.vlgmr.msra.gmra.mrb[8].mxu1 %v1001_v60 }
 0x39f   :  { %v1100_v61 = vpop.f32.mrb[8].mxu1 }
 0x3a0   :  { %1108 = vst.msk [vmem:[%s1664_s8] sm:$0xff] %vm1107_vm2, %v1100_v61  ;;  %v1297_v62 = vpop.f32.mrb[9].mxu1 }
 0x3a1   :  { %v1103_v63 = vpop.f32.mrb[10].mxu1 }
 0x3a2   :  { %1109 = vst.msk [vmem:[%s1664_s8 + $0x8] sm:$0xff] %vm1107_vm2, %v1103_v63  ;;  %v1298_v0 = vpop.f32.mrb[11].mxu1 }
 0x3a3   :  { %1114 = vsyncpa [#allocation3], 1 }
 0x3a4   :  { %1115 = vsyncpa [#allocation5], 1 }

</bundles_post_ra>
